<compile_context>
chip_gen: v7x
topology: tpu7x:2x2x1
jax: 0.10.0
libtpu: 0.0.40
codegen_flags: <defaults>
</compile_context>

<pallas_src>
import functools

import jax
import jax.numpy as jnp
from jax import lax
from jax.experimental import pallas as pl
from jax.experimental.pallas import tpu as pltpu


def _round_up(n, m):
    return ((n + m - 1) // m) * m


def _loc_head_kernel(x_ref, w_ref, b_ref, o_ref, *, true_d, ragged):
    # x_ref : (TB, TK) f32 activation tile (VMEM); edge tiles may overhang.
    # w_ref : (2, TK)  f32 weight tile (VMEM), lane-dense.
    # b_ref : (2,)     f32 bias (SMEM).
    # o_ref : (TB, 2)  f32 output tile (VMEM), resident across the k axis.
    k = pl.program_id(1)

    @pl.when(k == 0)
    def _init():
        # Fold the bias into the accumulator: column 0 -> b[0], column 1 -> b[1].
        col = lax.broadcasted_iota(jnp.int32, o_ref.shape, 1)
        o_ref[...] = jnp.where(col == 0, b_ref[0], b_ref[1]).astype(o_ref.dtype)

    x = jnp.maximum(x_ref[...], 0.0)                      # F.relu
    if ragged:
        # Zero out-of-bounds lanes of the overhanging last K tile: OOB VMEM is
        # garbage (possibly NaN) and relu does not mask positive/NaN junk.
        tk = x_ref.shape[1]
        col = lax.broadcasted_iota(jnp.int32, x.shape, 1)
        x = jnp.where(k * tk + col < true_d, x, 0.0)

    # Single-pass bf16 MXU matmul with f32 accumulation, contracting the shared
    # last axis: (TB, TK) . (2, TK)^T -> (TB, 2).  Accumulate into o_ref.
    o_ref[...] += lax.dot_general(
        x.astype(jnp.bfloat16),
        w_ref[...].astype(jnp.bfloat16),
        dimension_numbers=(((1,), (1,)), ((), ())),
        preferred_element_type=jnp.float32)


def localization_header_forward(x_nchw, weight, bias, *, block_b=512, block_d=2048):
    """Pallas forward for LocalizationHeaderNetwork.

    x_nchw: (B, C, H, W) float32
    weight: (2, D) float32, D = C*H*W   (nn.Linear(D, 2).weight)
    bias  : (2,)   float32              (nn.Linear(D, 2).bias)
    returns (B, 2) float32
    """
    B = x_nchw.shape[0]
    x_flat = x_nchw.reshape(B, -1)            # torch: x.view(x.size(0), -1)
    D = x_flat.shape[1]

    # ---- tile sizes ------------------------------------------------------
    block_b = max(8, (block_b // 8) * 8)
    block_d = max(128, (block_d // 128) * 128)

    # Batch tile: multiple of 8 (or the full B when B < 8); partial/overhanging
    # last tile is fine -- garbage rows are row-independent and clipped on
    # writeback, so no padding of x is ever materialized.
    tb = B if B < 8 else min(block_b, _round_up(B, 8))
    grid_b = int(pl.cdiv(B, tb))
    # Guarantee >= 2 blocks on the parallel axis so both v7x TCs get work.
    if grid_b < 2 and B >= 16:
        tb = _round_up(int(pl.cdiv(B, 2)), 8)
        grid_b = int(pl.cdiv(B, tb))

    # Reduction tile: full D when it fits, else a 128-multiple with an
    # in-kernel masked ragged tail.
    tk = D if D <= block_d else block_d
    nk = int(pl.cdiv(D, tk))
    Dp = nk * tk
    ragged = (D % tk) != 0

    # Only the tiny (2, D) weight is zero-padded (exact zeros => no garbage in
    # the weight tail lanes; x tail lanes are masked in-kernel).
    wmat = weight.astype(jnp.float32)
    if Dp != D:
        wmat = jnp.pad(wmat, ((0, 0), (0, Dp - D)))
    b_smem = bias.astype(jnp.float32)

    grid = (grid_b, nk)                       # reduction axis last

    kernel = functools.partial(_loc_head_kernel, true_d=D, ragged=ragged)

    # Raise scoped-VMEM limit only if caller-chosen tiles exceed the default.
    vmem_est = (2 * tb * tk * x_flat.dtype.itemsize   # x tile, double-buffered
                + 2 * 8 * tk * 4                      # (2, TK) weight, sublane-padded
                + 2 * tb * 128 * 4                    # (TB, 2) output, lane-padded
                + (1 << 20))
    cp_kwargs = dict(dimension_semantics=("parallel", "arbitrary"))
    if vmem_est > (16 << 20):
        cp_kwargs["vmem_limit_bytes"] = int(min(vmem_est + (4 << 20), 96 << 20))

    out = pl.pallas_call(
        kernel,
        out_shape=jax.ShapeDtypeStruct((B, 2), jnp.float32),
        grid=grid,
        in_specs=[
            pl.BlockSpec((tb, tk), lambda i, k: (i, k)),            # x tile
            pl.BlockSpec((2, tk), lambda i, k: (0, k)),             # weight tile
            pl.BlockSpec(memory_space=pltpu.MemorySpace.SMEM),      # bias
        ],
        out_specs=pl.BlockSpec((tb, 2), lambda i, k: (i, 0)),       # resident over k
        compiler_params=pltpu.CompilerParams(**cp_kwargs),
        cost_estimate=pl.CostEstimate(
            flops=int(2 * B * D * 2 + B * D),
            transcendentals=0,
            bytes_accessed=int(B * D * 4 + grid_b * Dp * 2 * 4 + B * 2 * 4)),
    )(x_flat, wmat, b_smem)

    return out


if __name__ == "__main__":
    key = jax.random.PRNGKey(0)
    kx, kw, kb = jax.random.split(key, 3)

    # Small shapes consistent with the module: NCHW conv-style feature map.
    B, C, H, W = 2, 4, 16, 16
    D = C * H * W

    x = jax.random.normal(kx, (B, C, H, W), dtype=jnp.float32)
    bound = 1.0 / (D ** 0.5)                  # PyTorch-style Linear init bound
    weight = jax.random.uniform(kw, (2, D), minval=-bound, maxval=bound,
                                dtype=jnp.float32)
    bias = jax.random.uniform(kb, (2,), minval=-bound, maxval=bound,
                              dtype=jnp.float32)

    out = jax.block_until_ready(localization_header_forward(x, weight, bias))
    assert out.shape == (B, 2)
    ref = jnp.maximum(x.reshape(B, -1), 0.0) @ weight.T + bias
    # bf16 MXU inputs with f32 accumulation: per-element rel error ~2^-8.
    assert jnp.allclose(out, ref, atol=1e-2, rtol=1e-2)

    # Exercise the ragged-K tail + overhanging batch tile path (D % TK != 0).
    B2, C2, H2, W2 = 10, 5, 24, 24            # D2 = 2880 > TK = 2048
    D2 = C2 * H2 * W2
    kx2, kw2, kb2 = jax.random.split(jax.random.PRNGKey(0), 3)
    x2 = jax.random.normal(kx2, (B2, C2, H2, W2), dtype=jnp.float32)
    bound2 = 1.0 / (D2 ** 0.5)
    w2 = jax.random.uniform(kw2, (2, D2), minval=-bound2, maxval=bound2,
                            dtype=jnp.float32)
    b2 = jax.random.uniform(kb2, (2,), minval=-bound2, maxval=bound2,
                            dtype=jnp.float32)
    out2 = jax.block_until_ready(localization_header_forward(x2, w2, b2))
    ref2 = jnp.maximum(x2.reshape(B2, -1), 0.0) @ w2.T + b2
    assert out2.shape == (B2, 2)
    assert jnp.allclose(out2, ref2, atol=1e-2, rtol=1e-2)

    print("KERNEL_OK")
</pallas_src>

<mosaic_0001>
module attributes {stable_mosaic.version = 11 : i64} {
  func.func @_loc_head_kernel(%arg0: i32, %arg1: i32, %arg2: memref<2x1024xf32, #tpu.memory_space<vmem>>, %arg3: memref<2x1024xf32, #tpu.memory_space<vmem>>, %arg4: memref<2xf32, #tpu.memory_space<smem>>, %arg5: memref<2x2xf32, #tpu.memory_space<vmem>>) attributes {dimension_semantics = [#tpu.dimension_semantics<parallel>, #tpu.dimension_semantics<arbitrary>], iteration_bounds = array<i64: 1, 1>, scalar_prefetch = 0 : i64, scratch_operands = 0 : i64, tpu.core_type = #tpu.core_type<tc>, window_params = [{transform_indices = @transform_0, window_bounds = array<i64: 2, 1024>}, {transform_indices = @transform_1, window_bounds = array<i64: 2, 1024>}, {transform_indices = @transform_2, window_bounds = array<i64: 2>}, {transform_indices = @transform_3, window_bounds = array<i64: 2, 2>}]} {
    %c0_i32 = arith.constant 0 : i32
    %0 = arith.cmpi eq, %arg1, %c0_i32 : i32
    %1 = arith.extui %0 : i1 to i32
    %c0_i32_0 = arith.constant 0 : i32
    %2 = arith.cmpi ne, %1, %c0_i32_0 : i32
    scf.if %2 {
      %13 = tpu.iota {dimensions = array<i32: 1>} : vector<2x2xi32>
      %c0_i32_9 = arith.constant 0 : i32
      %14 = vector.broadcast %c0_i32_9 : i32 to vector<2x2xi32>
      %15 = arith.cmpi eq, %13, %14 : vector<2x2xi32>
      %c0_10 = arith.constant 0 : index
      %16 = memref.load %arg4[%c0_10] : memref<2xf32, #tpu.memory_space<smem>>
      %c1 = arith.constant 1 : index
      %17 = memref.load %arg4[%c1] : memref<2xf32, #tpu.memory_space<smem>>
      %18 = vector.broadcast %16 : f32 to vector<2x2xf32>
      %19 = vector.broadcast %17 : f32 to vector<2x2xf32>
      %20 = arith.select %15, %18, %19 : vector<2x2xi1>, vector<2x2xf32>
      %c0_11 = arith.constant 0 : index
      %c0_12 = arith.constant 0 : index
      %21 = vector.load %arg5[%c0_11, %c0_12] : memref<2x2xf32, #tpu.memory_space<vmem>>, vector<2x2xf32>
      tpu.vector_store %arg5[%c0_11, %c0_12], %20 {strides = array<i32>} : memref<2x2xf32, #tpu.memory_space<vmem>>, vector<2x2xf32>,
    } else {
    }
    %c0 = arith.constant 0 : index
    %c0_1 = arith.constant 0 : index
    %3 = vector.load %arg2[%c0, %c0_1] : memref<2x1024xf32, #tpu.memory_space<vmem>>, vector<2x1024xf32>
    %cst = arith.constant 0.000000e+00 : f32
    %4 = vector.broadcast %cst : f32 to vector<2x1024xf32>
    %5 = arith.maximumf %3, %4 : vector<2x1024xf32>
    %c0_2 = arith.constant 0 : index
    %c0_3 = arith.constant 0 : index
    %6 = vector.load %arg5[%c0_2, %c0_3] : memref<2x2xf32, #tpu.memory_space<vmem>>, vector<2x2xf32>
    %7 = arith.truncf %5 : vector<2x1024xf32> to vector<2x1024xbf16>
    %c0_4 = arith.constant 0 : index
    %c0_5 = arith.constant 0 : index
    %8 = vector.load %arg3[%c0_4, %c0_5] : memref<2x1024xf32, #tpu.memory_space<vmem>>, vector<2x1024xf32>
    %9 = arith.truncf %8 : vector<2x1024xf32> to vector<2x1024xbf16>
    %cst_6 = arith.constant dense<0.000000e+00> : vector<2x2xf32>
    %10 = tpu.matmul %7, %9, %cst_6 {dimension_numbers = #tpu.dot_dimension_numbers<[1], [1], [0], [0], [0, 0, 1, 0], [], []>} : vector<2x1024xbf16>, vector<2x1024xbf16>, vector<2x2xf32> -> vector<2x2xf32>
    %11 = arith.addf %6, %10 : vector<2x2xf32>
    %c0_7 = arith.constant 0 : index
    %c0_8 = arith.constant 0 : index
    %12 = vector.load %arg5[%c0_7, %c0_8] : memref<2x2xf32, #tpu.memory_space<vmem>>, vector<2x2xf32>
    tpu.vector_store %arg5[%c0_7, %c0_8], %11 {strides = array<i32>} : memref<2x2xf32, #tpu.memory_space<vmem>>, vector<2x2xf32>,
    return
  }
  func.func @transform_0(%arg0: i32, %arg1: i32) -> (i32, i32) {
    %c0_i32 = arith.constant 0 : i32
    return %arg0, %arg1 : i32, i32
  }
  func.func @transform_1(%arg0: i32, %arg1: i32) -> (i32, i32) {
    %c0_i32 = arith.constant 0 : i32
    %c0_i32_0 = arith.constant 0 : i32
    return %c0_i32, %arg1 : i32, i32
  }
  func.func @transform_2(%arg0: i32, %arg1: i32) -> i32 {
    %c0_i32 = arith.constant 0 : i32
    %c0_i32_0 = arith.constant 0 : i32
    return %c0_i32 : i32
  }
  func.func @transform_3(%arg0: i32, %arg1: i32) -> (i32, i32) {
    %c0_i32 = arith.constant 0 : i32
    %c0_i32_0 = arith.constant 0 : i32
    return %arg0, %c0_i32 : i32, i32
  }
}

</mosaic_0001>

<bundles_post_ra>
// kernel: tpu_custom_call.1
= control target key start
LH: loop header
LB: loop body
LE: loop exit
PB: predicated region body
PF: predicated region fallthrough
CT: control target
= control target key end

     0   :  { %8 = vsyncpa [#allocation3], 0  ;;  %s520_s0 = inlined_call_operand.hbm [shape: f32[2,1024], index: 0, kind: input, shape index: {}]   ;;  %s521_s1 = inlined_call_operand.hbm [shape: f32[2,1024], index: 1, kind: input, shape index: {}]   ;;  %s522_s2 = inlined_call_operand.vmem [shape: f32[2], index: 2, kind: input, shape index: {}]   ;;  %s523_s3 = inlined_call_operand.hbm [shape: f32[2,2], index: 3, kind: output, shape index: {}]  }
   0x1   :  { %9 = vsyncpa [#allocation7], 0 }
   0x2   :  { %10 = vsyncpa [#allocation5], 0 }
   0x3   :  { %11 = vsyncpa [#allocation4], 0  ;;  %s452_s12 = smov [#allocation2]   ;;  %s453_s14 = smov [#allocation6]  }
   0x4   :  { %s18_s13 = sshll.u32 %s452_s12, 4  ;;  %s28_s15 = sshll.u32 %s453_s14, 4  ;;  %s19_s13 = int_to_ptr.vmem [resolvable:$true] %s18_s13  ;;  %s29_s15 = int_to_ptr.vmem [resolvable:$true] %s28_s15 }
   0x5   :  { %s366_s18 = scalar_lea.hbm %s520_s0, 256 }
   0x6   :  { %p367_p0 = scmp.ne.s32.totalorder %s520_s0, %s366_s18  ;;  %p370_p1 = scmp.lt.u32.totalorder %s366_s18, %s520_s0 }
   0x8   :  { %p372_p2 = pnand %p370_p1, %p367_p0 }
   0xa   :  { %375 = shalt.err (!%p372_p2)
}
   0xb   :  { %s376_s23 = scalar_lea.vmem %s19_s13, 256  ;;  %p381_p4 = scmp.lt.s32.totalorder %s19_s13, %s19_s13 }
   0xc   :  { %p377_p3 = scmp.ne.s32.totalorder %s19_s13, %s376_s23  ;;  %p382_p5 = scmp.lt.s32.totalorder %s376_s23, %s376_s23 }
   0xe   :  { %p383_p6 = por %p382_p5, %p381_p4 }
  0x10   :  { %p384_p7 = pnand %p383_p6, %p377_p3 }
  0x12   :  { %387 = shalt.err (!%p384_p7)
}
  0x13   :  { %21 = dma.hbm_to_vmem [thread:$0]  %s520_s0, 256, %s19_s13, [#allocation3]  }
  0x14   :  { %s388_s28 = scalar_lea.hbm %s521_s1, 256 }
  0x15   :  { %p389_p8 = scmp.ne.s32.totalorder %s521_s1, %s388_s28  ;;  %p392_p9 = scmp.lt.u32.totalorder %s388_s28, %s521_s1 }
  0x17   :  { %p394_p10 = pnand %p392_p9, %p389_p8 }
  0x19   :  { %397 = shalt.err (!%p394_p10)
}
  0x1a   :  { %s398_s6 = scalar_lea.vmem %s29_s15, 256  ;;  %p403_p12 = scmp.lt.s32.totalorder %s29_s15, %s29_s15 }
  0x1b   :  { %p399_p11 = scmp.ne.s32.totalorder %s29_s15, %s398_s6  ;;  %p404_p13 = scmp.lt.s32.totalorder %s398_s6, %s398_s6 }
  0x1d   :  { %p405_p0 = por %p404_p13, %p403_p12 }
  0x1f   :  { %p406_p1 = pnand %p405_p0, %p399_p11 }
  0x21   :  { %409 = shalt.err (!%p406_p1)
}
  0x22   :  { %31 = dma.hbm_to_vmem [thread:$0]  %s521_s1, 256, %s29_s15, [#allocation7]  }
  0x23   :  { %s38_s10 = sshll.u32 %s522_s2, 4  ;;  %s39_s10 = int_to_ptr.vmem [resolvable:$true] %s38_s10 }
  0x24   :  { %s410_s11 = scalar_lea.vmem %s39_s10, 16  ;;  %p415_p3 = scmp.lt.s32.totalorder %s39_s10, %s39_s10 }
  0x25   :  { %p411_p2 = scmp.ne.s32.totalorder %s39_s10, %s410_s11  ;;  %p416_p4 = scmp.lt.s32.totalorder %s410_s11, %s410_s11 }
  0x27   :  { %p417_p5 = por %p416_p4, %p415_p3 }
  0x29   :  { %p418_p6 = pnand %p417_p5, %p411_p2 }
  0x2b   :  { %421 = shalt.err (!%p418_p6)
}
  0x2c   :  { %s454_s12 = smov [#allocation8]  }
  0x2d   :  { %41 = dma.vmem_to_smem %s39_s10, 16, %s454_s12, [#allocation5]  }
  0x2e   :  { %444 = dma.done.wait [#allocation3], 256  }
  0x2f   :  { %445 = vsyncadd [#allocation3], 4294967040 }
  0x30   :  { %446 = dma.done.wait [#allocation7], 256  }
  0x31   :  { %447 = vsyncadd [#allocation7], 4294967040 }
  0x32   :  { %448 = dma.done.wait [#allocation5], 16  }
  0x33   :  { %449 = vsyncadd [#allocation5], 4294967280 }
  0x34   :  { %51 = sfence }
  0x35   :  { %v57_v0 = vlaneseq  ;;  %v124_v1 = vld [vmem:[#allocation6] sm:$0xff]  ;;  %v67_v2 = vld [vmem:[#allocation2] sm:$0xff]  ;;  %v455_v3 = vmov 1983009808   ;;  %v125_v6 = vld [vmem:[#allocation6 + $0x8] sm:$0xff]  ;;  %s60_s1 = sld [smem:[#allocation8]] }
  0x36   :  { %v76_v4 = vunpack.c.l.s4 %v455_v3  ;;  %v69_v5 = vmax.f32 %v67_v2, 0.0  ;;  %v68_v7 = vld [vmem:[#allocation2 + $0x8] sm:$0xff]  ;;  %v128_v11 = vcombine.high %v124_v1, %v124_v1  ;;  %v145_v13 = vcombine.high %v125_v6, %v125_v6  ;;  %s358_s2 = sld [smem:[#allocation8 + $0x1]]  ;;  %s456_s13 = smov [#allocation9]  }
  0x37   :  { %v79_v8 = vshrl.u32 %v57_v0, 7  ;;  %v70_v9 = vmax.f32 %v68_v7, 0.0  ;;  %v58_v48 = vand.u32 127, %v57_v0  ;;  %vm65_vm1 = vcmask 9216   ;;  %s347_s14 = sshll.u32 %s456_s13, 4  ;;  %s348_s14 = int_to_ptr.vmem [resolvable:$true] %s347_s14 }
  0x38   :  { %v77_v10 = vunpack.c.0.s8 %v76_v4  ;;  %v74_v12 = vcombine.high %v69_v5, %v69_v5  ;;  %s422_s15 = scalar_lea.vmem %s348_s14, 32  ;;  %p427_p8 = scmp.lt.s32.totalorder %s348_s14, %s348_s14 }
  0x39   :  { %v91_v15 = vcombine.high %v70_v9, %v70_v9  ;;  %vm59_vm0 = vcmp.eq.s32.totalorder %v58_v48, 0  ;;  %p423_p7 = scmp.ne.s32.totalorder %s348_s14, %s422_s15  ;;  %p428_p9 = scmp.lt.s32.totalorder %s422_s15, %s422_s15 }
  0x3a   :  { %v80_v14 = vsub.s32 %v77_v10, %v79_v8 }
  0x3b   :  { %v62_v49 = vstv %s60_s1  ;;  %p429_p10 = por %p428_p9, %p427_p8 }
  0x3c   :  { %v135_v16 = vrot.slane %v124_v1, %v80_v14  ;;  %v142_v17 = vrot.slane %v128_v11, %v80_v14  ;;  %v81_v18 = vrot.slane %v69_v5, %v80_v14  ;;  %v88_v19 = vrot.slane %v74_v12, %v80_v14 }
  0x3d   :  { %v152_v20 = vrot.slane %v125_v6, %v80_v14  ;;  %v159_v21 = vrot.slane %v145_v13, %v80_v14  ;;  %v98_v24 = vrot.slane %v70_v9, %v80_v14  ;;  %v105_v25 = vrot.slane %v91_v15, %v80_v14  ;;  %p430_p11 = pnand %p429_p10, %p423_p7 }
  0x3e   :  { %v143_v22 = vcombine.high %v135_v16, %v135_v16  ;;  %v144_v23 = vcombine.high %v142_v17, %v142_v17  ;;  %v170_v26 = vpack.c.bf16 %v135_v16, %v135_v16  ;;  %v172_v27 = vpack.c.bf16 %v142_v17, %v142_v17 }
  0x3f   :  { %v89_v28 = vcombine.high %v81_v18, %v81_v18  ;;  %v90_v29 = vcombine.high %v88_v19, %v88_v19  ;;  %v160_v32 = vcombine.high %v152_v20, %v152_v20  ;;  %v161_v33 = vcombine.high %v159_v21, %v159_v21 }
  0x40   :  { %v171_v30 = vpack.c.bf16 %v143_v22, %v143_v22  ;;  %v173_v31 = vpack.c.bf16 %v144_v23, %v144_v23  ;;  %v106_v38 = vcombine.high %v98_v24, %v98_v24  ;;  %v107_v39 = vcombine.high %v105_v25, %v105_v25 }
  0x41   :  { %v117_v34 = vpack.c.bf16 %v89_v28, %v89_v28  ;;  %v119_v35 = vpack.c.bf16 %v90_v29, %v90_v29  ;;  %v175_v36 = vpack.c.bf16 %v160_v32, %v160_v32  ;;  %v177_v37 = vpack.c.bf16 %v161_v33, %v161_v33 }
  0x42   :  { %178 = vmatprep.subr.bf16.mxu0 %v171_v30  ;;  %218 = vmatprep.subr.bf16.mxu1 %v173_v31  ;;  %v116_v40 = vpack.c.bf16 %v81_v18, %v81_v18  ;;  %v118_v41 = vpack.c.bf16 %v88_v19, %v88_v19  ;;  %v174_v42 = vpack.c.bf16 %v152_v20, %v152_v20  ;;  %v63_v50 = vstv %s358_s2 }
  0x43   :  { %179 = vmatpush1.bf16.xpose.msra.mxu0 %v170_v26  ;;  %219 = vmatpush1.bf16.xpose.msra.mxu1 %v172_v27  ;;  %v176_v43 = vpack.c.bf16 %v159_v21, %v159_v21  ;;  %v121_v44 = vpack.c.bf16 %v106_v38, %v106_v38  ;;  %v123_v45 = vpack.c.bf16 %v107_v39, %v107_v39 }
  0x44   :  { %210 = vmatprep.mubr.bf16.mxu0 %v117_v34  ;;  %250 = vmatprep.mubr.bf16.mxu1 %v119_v35  ;;  %v120_v46 = vpack.c.bf16 %v98_v24, %v98_v24  ;;  %v122_v47 = vpack.c.bf16 %v105_v25, %v105_v25  ;;  %v64_v51 = vsel %vm59_vm0, %v62_v49, %v63_v50 }
  0x45   :  { %258 = vmatprep.subr.bf16.mxu0 %v175_v36  ;;  %298 = vmatprep.subr.bf16.mxu1 %v177_v37  ;;  %66 = vst.msk [vmem:[#allocation9] sm:$0x3] %vm65_vm1, %v64_v51 }
  0x4a   :  { %211 = vmatmul.mubr.bf16.vlgmr.msra.gmra.mrb[0].mxu0 %v116_v40  ;;  %251 = vmatmul.mubr.bf16.vlgmr.msra.gmra.mrb[0].mxu1 %v118_v41 }
  0x4b   :  { %259 = vmatpush1.bf16.xpose.msra.mxu0 %v174_v42  ;;  %299 = vmatpush1.bf16.xpose.msra.mxu1 %v176_v43 }
  0x4c   :  { %290 = vmatprep.mubr.bf16.mxu0 %v121_v44  ;;  %330 = vmatprep.mubr.bf16.mxu1 %v123_v45  ;;  %v71_v2 = vld [vmem:[#allocation9] sm:$0x3] }
  0x52   :  { %291 = vmatmul.mubr.bf16.vlgmr.msra.gmra.mrb[4].mxu0 %v120_v46  ;;  %331 = vmatmul.mubr.bf16.vlgmr.msra.gmra.mrb[4].mxu1 %v122_v47 }
 0x11d   :  { %v212_v52 = vpop.f32.mrb[0].mxu0  ;;  %v252_v53 = vpop.f32.mrb[0].mxu1 }
 0x11e   :  { %v253_v54 = vadd.f32 %v252_v53, %v212_v52  ;;  %v214_v55 = vpop.f32.mrb[1].mxu0  ;;  %v254_v56 = vpop.f32.mrb[1].mxu1 }
 0x11f   :  { %v215_v57 = vpop.f32.mrb[2].mxu0  ;;  %v255_v58 = vpop.f32.mrb[2].mxu1 }
 0x120   :  { %v216_v59 = vpop.f32.mrb[3].mxu0  ;;  %v256_v60 = vpop.f32.mrb[3].mxu1 }
 0x125   :  { %v292_v61 = vpop.f32.mrb[4].mxu0  ;;  %v332_v62 = vpop.f32.mrb[4].mxu1 }
 0x126   :  { %v293_v63 = vadd.f32 %v292_v61, %v253_v54  ;;  %v294_v0 = vpop.f32.mrb[5].mxu0  ;;  %v334_v1 = vpop.f32.mrb[5].mxu1 }
 0x127   :  { %v295_v3 = vpop.f32.mrb[6].mxu0  ;;  %v335_v4 = vpop.f32.mrb[6].mxu1 }
 0x128   :  { %v333_v5 = vadd.f32 %v332_v62, %v293_v63  ;;  %v296_v6 = vpop.f32.mrb[7].mxu0  ;;  %v336_v7 = vpop.f32.mrb[7].mxu1 }
 0x12a   :  { %v338_v8 = vadd.f32 %v333_v5, %v71_v2 }
 0x12c   :  { %340 = vst.msk [vmem:[#allocation9] sm:$0x3] %vm65_vm1, %v338_v8 }
 0x12d   :  { %433 = shalt.err (!%p430_p11)
}
 0x12e   :  { %s434_s18 = scalar_lea.hbm %s523_s3, 32 }
 0x12f   :  { %p435_p12 = scmp.ne.s32.totalorder %s523_s3, %s434_s18  ;;  %p438_p13 = scmp.lt.u32.totalorder %s434_s18, %s523_s3 }
 0x131   :  { %p440_p0 = pnand %p438_p13, %p435_p12 }
 0x133   :  { %443 = shalt.err (!%p440_p0)
}
 0x134   :  { %350 = dma.vmem_to_hbm [thread:$0]  %s348_s14, 32, %s523_s3, [#allocation4]  }
 0x135   :  { %450 = dma.done.wait [#allocation4], 32  }
 0x136   :  { %451 = vsyncadd [#allocation4], 4294967264 }
 0x137   :  { %354 = vsyncpa [#allocation3], 1 }
 0x138   :  { %355 = vsyncpa [#allocation7], 1 }
 0x139   :  { %356 = vsyncpa [#allocation4], 1 }
 0x13a   :  { %357 = vsyncpa [#allocation5], 1 }

</bundles_post_ra>
